<compile_context>
chip_gen: v6e
topology: v6e:2x2x1
jax: 0.10.0
libtpu: 0.0.40
codegen_flags: <defaults>
</compile_context>

<pallas_src>
import jax
import jax.numpy as jnp
import numpy as np
from jax import lax
from jax.experimental import pallas as pl
from jax.experimental.pallas import tpu as pltpu

HIDDEN = 32   # hidden_size
VOCAB = 32    # input_vocab_size
SEQ = 8       # num_input_tokens


def gru_encoder_kernel(ids_ref,    # VMEM (T, 1) int32 token ids
                       emb_ref,    # VMEM (V, H) embedding table
                       wih_ref,    # VMEM (H, 3H) fused input weights (x @ W), cols [r|z|n]
                       whh_ref,    # VMEM (H, 3H) fused hidden weights (h @ W), cols [r|z|n]
                       bih_ref,    # VMEM (1, 3H)
                       bhh_ref,    # VMEM (1, 3H)
                       out_ref,    # VMEM (T, H) encoder outputs
                       hfin_ref):  # VMEM (1, H) final hidden
    T, H = out_ref.shape
    V = emb_ref.shape[0]

    # ---- Hoisted out of the recurrence ------------------------------------
    # One-hot gather on the MXU (OOB ids -> zero rows, no raw VMEM OOB reads),
    # then ONE fused input-gate projection for all T steps:
    #   gi_all[t] = x_t @ W_ih^T + b_ih.
    ids = ids_ref[...]                                                      # (T, 1)
    onehot = (lax.broadcasted_iota(jnp.int32, (T, V), 1) == ids
              ).astype(jnp.float32)                                         # (T, V)
    xs = jnp.dot(onehot, emb_ref[...],
                 preferred_element_type=jnp.float32)                        # (T, H)
    gi_all = jnp.dot(xs, wih_ref[...],
                     preferred_element_type=jnp.float32) + bih_ref[...]     # (T, 3H)

    whh = whh_ref[...]          # (H, 3H), held in registers across the loop
    bhh = bhh_ref[...]          # (1, 3H)

    # ---- Serial recurrence: one fused MXU op + two EUP pushes per step -----
    h = jnp.zeros((1, H), dtype=jnp.float32)    # initHidden(): zeros (1, hidden_size)
    for t in range(T):                          # T static -> fully unrolled
        gi = gi_all[t:t + 1, :]                                             # (1, 3H)
        gh = jnp.dot(h, whh, preferred_element_type=jnp.float32) + bhh      # (1, 3H)
        # PyTorch GRU gate equations (gate order: r, z, n); fused r/z sigmoid.
        s = gi + gh                                                         # (1, 3H)
        rz = jax.nn.sigmoid(s[:, :2 * H])                                   # (1, 2H)
        r = rz[:, :H]
        z = rz[:, H:2 * H]
        n = jnp.tanh(gi[:, 2 * H:] + r * gh[:, 2 * H:])   # b_hn stays inside r*(...)
        h = (1.0 - z) * n + z * h
        out_ref[t:t + 1, :] = h                 # per-step store on the idle vst slot

    hfin_ref[...] = h


def encoder_forward(ids, emb, w_ih, w_hh, b_ih, b_hh):
    """ids: (T,) int32; emb: (V, H); w_ih/w_hh: (3H, H) in PyTorch [r,z,n] order;
    b_ih/b_hh: (3H,).  Returns (encoder outputs (T, H), final hidden (1, H))."""
    T = int(ids.shape[0])
    V, H = emb.shape

    # Layout prep (plain JAX glue): transpose so the kernel computes x @ W,
    # keeping the fused [r|z|n] column order of torch.nn.GRU.
    wih_t = jnp.asarray(w_ih, jnp.float32).T          # (H, 3H)
    whh_t = jnp.asarray(w_hh, jnp.float32).T          # (H, 3H)
    bih = jnp.asarray(b_ih, jnp.float32).reshape(1, 3 * H)
    bhh = jnp.asarray(b_hh, jnp.float32).reshape(1, 3 * H)
    ids2d = jnp.asarray(ids, jnp.int32).reshape(T, 1)  # (T, 1) for one-hot compare

    vmem = pl.BlockSpec(memory_space=pltpu.MemorySpace.VMEM)

    outs, hfin = pl.pallas_call(
        gru_encoder_kernel,
        out_shape=(jax.ShapeDtypeStruct((T, H), jnp.float32),
                   jax.ShapeDtypeStruct((1, H), jnp.float32)),
        in_specs=[vmem, vmem, vmem, vmem, vmem, vmem],
        out_specs=(vmem, vmem),
    )(ids2d, jnp.asarray(emb, jnp.float32),
      wih_t, whh_t, bih, bhh)
    return outs, hfin


def ref_encoder(ids, emb, w_ih, w_hh, b_ih, b_hh):
    """Pure-JAX reference reproducing torch.nn.GRU(batch_first=True) semantics."""
    H = emb.shape[1]
    h = jnp.zeros((1, H), jnp.float32)
    outs = []
    for t in range(ids.shape[0]):
        x = emb[ids[t]][None, :]
        gi = x @ w_ih.T + b_ih
        gh = h @ w_hh.T + b_hh
        r = jax.nn.sigmoid(gi[:, :H] + gh[:, :H])
        z = jax.nn.sigmoid(gi[:, H:2 * H] + gh[:, H:2 * H])
        n = jnp.tanh(gi[:, 2 * H:] + r * gh[:, 2 * H:])
        h = (1.0 - z) * n + z * h
        outs.append(h)
    return jnp.concatenate(outs, axis=0), h


if __name__ == "__main__":
    key = jax.random.PRNGKey(0)
    k_ids, k_emb, k_wih, k_whh, k_bih, k_bhh = jax.random.split(key, 6)

    H, V, T = HIDDEN, VOCAB, SEQ
    bound = 1.0 / np.sqrt(H)  # PyTorch GRU init range

    ids = jax.random.randint(k_ids, (T,), 0, V, dtype=jnp.int32)
    emb = jax.random.normal(k_emb, (V, H), dtype=jnp.float32)            # nn.Embedding ~ N(0,1)
    w_ih = jax.random.uniform(k_wih, (3 * H, H), jnp.float32, -bound, bound)
    w_hh = jax.random.uniform(k_whh, (3 * H, H), jnp.float32, -bound, bound)
    b_ih = jax.random.uniform(k_bih, (3 * H,), jnp.float32, -bound, bound)
    b_hh = jax.random.uniform(k_bhh, (3 * H,), jnp.float32, -bound, bound)

    outs, hfin = encoder_forward(ids, emb, w_ih, w_hh, b_ih, b_hh)
    outs = jax.block_until_ready(outs)
    hfin = jax.block_until_ready(hfin)

    ref_outs, ref_h = ref_encoder(ids, emb, w_ih, w_hh, b_ih, b_hh)
    assert outs.shape == (T, H) and hfin.shape == (1, H)
    np.testing.assert_allclose(np.asarray(outs), np.asarray(ref_outs), rtol=1e-4, atol=1e-5)
    np.testing.assert_allclose(np.asarray(hfin), np.asarray(ref_h), rtol=1e-4, atol=1e-5)

    print("KERNEL_OK")
</pallas_src>

<mosaic_0001>
module attributes {stable_mosaic.version = 11 : i64} {
  func.func @gru_encoder_kernel(%arg0: memref<8x1xi32, #tpu.memory_space<vmem>>, %arg1: memref<32x32xf32, #tpu.memory_space<vmem>>, %arg2: memref<32x96xf32, #tpu.memory_space<vmem>>, %arg3: memref<32x96xf32, #tpu.memory_space<vmem>>, %arg4: memref<1x96xf32, #tpu.memory_space<vmem>>, %arg5: memref<1x96xf32, #tpu.memory_space<vmem>>, %arg6: memref<8x32xf32, #tpu.memory_space<vmem>>, %arg7: memref<1x32xf32, #tpu.memory_space<vmem>>) attributes {dimension_semantics = [], scalar_prefetch = 0 : i64, scratch_operands = 0 : i64, tpu.core_type = #tpu.core_type<tc>} {
    %c0 = arith.constant 0 : index
    %c0_0 = arith.constant 0 : index
    %0 = vector.load %arg0[%c0, %c0_0] : memref<8x1xi32, #tpu.memory_space<vmem>>, vector<8x1xi32>
    %1 = tpu.iota {dimensions = array<i32: 1>} : vector<8x32xi32>
    %2 = vector.broadcast %0 : vector<8x1xi32> to vector<8x32xi32>
    %3 = arith.cmpi eq, %1, %2 : vector<8x32xi32>
    %4 = arith.extui %3 : vector<8x32xi1> to vector<8x32xi32>
    %5 = arith.sitofp %4 : vector<8x32xi32> to vector<8x32xf32>
    %c0_1 = arith.constant 0 : index
    %c0_2 = arith.constant 0 : index
    %6 = vector.load %arg1[%c0_1, %c0_2] : memref<32x32xf32, #tpu.memory_space<vmem>>, vector<32x32xf32>
    %cst = arith.constant dense<0.000000e+00> : vector<8x32xf32>
    %7 = tpu.matmul %5, %6, %cst {dimension_numbers = #tpu.dot_dimension_numbers<[1], [0], [0], [1], [0, 0, 1, 1], [], []>} : vector<8x32xf32>, vector<32x32xf32>, vector<8x32xf32> -> vector<8x32xf32>
    %c0_3 = arith.constant 0 : index
    %c0_4 = arith.constant 0 : index
    %8 = vector.load %arg2[%c0_3, %c0_4] : memref<32x96xf32, #tpu.memory_space<vmem>>, vector<32x96xf32>
    %cst_5 = arith.constant dense<0.000000e+00> : vector<8x96xf32>
    %9 = tpu.matmul %7, %8, %cst_5 {dimension_numbers = #tpu.dot_dimension_numbers<[1], [0], [0], [1], [0, 0, 1, 1], [], []>} : vector<8x32xf32>, vector<32x96xf32>, vector<8x96xf32> -> vector<8x96xf32>
    %c0_6 = arith.constant 0 : index
    %c0_7 = arith.constant 0 : index
    %10 = vector.load %arg4[%c0_6, %c0_7] : memref<1x96xf32, #tpu.memory_space<vmem>>, vector<1x96xf32>
    %11 = vector.broadcast %10 : vector<1x96xf32> to vector<8x96xf32>
    %12 = arith.addf %9, %11 : vector<8x96xf32>
    %c0_8 = arith.constant 0 : index
    %c0_9 = arith.constant 0 : index
    %13 = vector.load %arg3[%c0_8, %c0_9] : memref<32x96xf32, #tpu.memory_space<vmem>>, vector<32x96xf32>
    %c0_10 = arith.constant 0 : index
    %c0_11 = arith.constant 0 : index
    %14 = vector.load %arg5[%c0_10, %c0_11] : memref<1x96xf32, #tpu.memory_space<vmem>>, vector<1x96xf32>
    %cst_12 = arith.constant 0.000000e+00 : f32
    %15 = vector.broadcast %cst_12 : f32 to vector<1x32xf32>
    %16 = vector.extract_strided_slice %12 {offsets = [0, 0], sizes = [1, 96], strides = [1, 1]} : vector<8x96xf32> to vector<1x96xf32>
    %cst_13 = arith.constant dense<0.000000e+00> : vector<1x96xf32>
    %17 = tpu.matmul %15, %13, %cst_13 {dimension_numbers = #tpu.dot_dimension_numbers<[1], [0], [0], [1], [0, 0, 1, 1], [], []>} : vector<1x32xf32>, vector<32x96xf32>, vector<1x96xf32> -> vector<1x96xf32>
    %18 = arith.addf %17, %14 : vector<1x96xf32>
    %19 = arith.addf %16, %18 : vector<1x96xf32>
    %20 = vector.extract_strided_slice %19 {offsets = [0, 0], sizes = [1, 64], strides = [1, 1]} : vector<1x96xf32> to vector<1x64xf32>
    %21 = arith.negf %20 : vector<1x64xf32>
    %22 = math.exp %21 : vector<1x64xf32>
    %cst_14 = arith.constant 1.000000e+00 : f32
    %23 = vector.broadcast %cst_14 : f32 to vector<1x64xf32>
    %24 = arith.addf %23, %22 : vector<1x64xf32>
    %25 = arith.divf %23, %24 : vector<1x64xf32>
    %26 = vector.extract_strided_slice %25 {offsets = [0, 0], sizes = [1, 32], strides = [1, 1]} : vector<1x64xf32> to vector<1x32xf32>
    %27 = vector.extract_strided_slice %25 {offsets = [0, 32], sizes = [1, 32], strides = [1, 1]} : vector<1x64xf32> to vector<1x32xf32>
    %28 = vector.extract_strided_slice %16 {offsets = [0, 64], sizes = [1, 32], strides = [1, 1]} : vector<1x96xf32> to vector<1x32xf32>
    %29 = vector.extract_strided_slice %18 {offsets = [0, 64], sizes = [1, 32], strides = [1, 1]} : vector<1x96xf32> to vector<1x32xf32>
    %30 = arith.mulf %26, %29 : vector<1x32xf32>
    %31 = arith.addf %28, %30 : vector<1x32xf32>
    %32 = math.tanh %31 : vector<1x32xf32>
    %cst_15 = arith.constant 1.000000e+00 : f32
    %33 = vector.broadcast %cst_15 : f32 to vector<1x32xf32>
    %34 = arith.subf %33, %27 : vector<1x32xf32>
    %35 = arith.mulf %34, %32 : vector<1x32xf32>
    %36 = arith.mulf %27, %15 : vector<1x32xf32>
    %37 = arith.addf %35, %36 : vector<1x32xf32>
    %c0_16 = arith.constant 0 : index
    %c0_17 = arith.constant 0 : index
    %38 = vector.load %arg6[%c0_16, %c0_17] : memref<8x32xf32, #tpu.memory_space<vmem>>, vector<1x32xf32>
    tpu.vector_store %arg6[%c0_16, %c0_17], %37 {strides = array<i32>} : memref<8x32xf32, #tpu.memory_space<vmem>>, vector<1x32xf32>,
    %39 = vector.extract_strided_slice %12 {offsets = [1, 0], sizes = [1, 96], strides = [1, 1]} : vector<8x96xf32> to vector<1x96xf32>
    %cst_18 = arith.constant dense<0.000000e+00> : vector<1x96xf32>
    %40 = tpu.matmul %37, %13, %cst_18 {dimension_numbers = #tpu.dot_dimension_numbers<[1], [0], [0], [1], [0, 0, 1, 1], [], []>} : vector<1x32xf32>, vector<32x96xf32>, vector<1x96xf32> -> vector<1x96xf32>
    %41 = arith.addf %40, %14 : vector<1x96xf32>
    %42 = arith.addf %39, %41 : vector<1x96xf32>
    %43 = vector.extract_strided_slice %42 {offsets = [0, 0], sizes = [1, 64], strides = [1, 1]} : vector<1x96xf32> to vector<1x64xf32>
    %44 = arith.negf %43 : vector<1x64xf32>
    %45 = math.exp %44 : vector<1x64xf32>
    %cst_19 = arith.constant 1.000000e+00 : f32
    %46 = vector.broadcast %cst_19 : f32 to vector<1x64xf32>
    %47 = arith.addf %46, %45 : vector<1x64xf32>
    %48 = arith.divf %46, %47 : vector<1x64xf32>
    %49 = vector.extract_strided_slice %48 {offsets = [0, 0], sizes = [1, 32], strides = [1, 1]} : vector<1x64xf32> to vector<1x32xf32>
    %50 = vector.extract_strided_slice %48 {offsets = [0, 32], sizes = [1, 32], strides = [1, 1]} : vector<1x64xf32> to vector<1x32xf32>
    %51 = vector.extract_strided_slice %39 {offsets = [0, 64], sizes = [1, 32], strides = [1, 1]} : vector<1x96xf32> to vector<1x32xf32>
    %52 = vector.extract_strided_slice %41 {offsets = [0, 64], sizes = [1, 32], strides = [1, 1]} : vector<1x96xf32> to vector<1x32xf32>
    %53 = arith.mulf %49, %52 : vector<1x32xf32>
    %54 = arith.addf %51, %53 : vector<1x32xf32>
    %55 = math.tanh %54 : vector<1x32xf32>
    %cst_20 = arith.constant 1.000000e+00 : f32
    %56 = vector.broadcast %cst_20 : f32 to vector<1x32xf32>
    %57 = arith.subf %56, %50 : vector<1x32xf32>
    %58 = arith.mulf %57, %55 : vector<1x32xf32>
    %59 = arith.mulf %50, %37 : vector<1x32xf32>
    %60 = arith.addf %58, %59 : vector<1x32xf32>
    %c1 = arith.constant 1 : index
    %c0_21 = arith.constant 0 : index
    %61 = vector.load %arg6[%c1, %c0_21] : memref<8x32xf32, #tpu.memory_space<vmem>>, vector<1x32xf32>
    tpu.vector_store %arg6[%c1, %c0_21], %60 {strides = array<i32>} : memref<8x32xf32, #tpu.memory_space<vmem>>, vector<1x32xf32>,
    %62 = vector.extract_strided_slice %12 {offsets = [2, 0], sizes = [1, 96], strides = [1, 1]} : vector<8x96xf32> to vector<1x96xf32>
    %cst_22 = arith.constant dense<0.000000e+00> : vector<1x96xf32>
    %63 = tpu.matmul %60, %13, %cst_22 {dimension_numbers = #tpu.dot_dimension_numbers<[1], [0], [0], [1], [0, 0, 1, 1], [], []>} : vector<1x32xf32>, vector<32x96xf32>, vector<1x96xf32> -> vector<1x96xf32>
    %64 = arith.addf %63, %14 : vector<1x96xf32>
    %65 = arith.addf %62, %64 : vector<1x96xf32>
    %66 = vector.extract_strided_slice %65 {offsets = [0, 0], sizes = [1, 64], strides = [1, 1]} : vector<1x96xf32> to vector<1x64xf32>
    %67 = arith.negf %66 : vector<1x64xf32>
    %68 = math.exp %67 : vector<1x64xf32>
    %cst_23 = arith.constant 1.000000e+00 : f32
    %69 = vector.broadcast %cst_23 : f32 to vector<1x64xf32>
    %70 = arith.addf %69, %68 : vector<1x64xf32>
    %71 = arith.divf %69, %70 : vector<1x64xf32>
    %72 = vector.extract_strided_slice %71 {offsets = [0, 0], sizes = [1, 32], strides = [1, 1]} : vector<1x64xf32> to vector<1x32xf32>
    %73 = vector.extract_strided_slice %71 {offsets = [0, 32], sizes = [1, 32], strides = [1, 1]} : vector<1x64xf32> to vector<1x32xf32>
    %74 = vector.extract_strided_slice %62 {offsets = [0, 64], sizes = [1, 32], strides = [1, 1]} : vector<1x96xf32> to vector<1x32xf32>
    %75 = vector.extract_strided_slice %64 {offsets = [0, 64], sizes = [1, 32], strides = [1, 1]} : vector<1x96xf32> to vector<1x32xf32>
    %76 = arith.mulf %72, %75 : vector<1x32xf32>
    %77 = arith.addf %74, %76 : vector<1x32xf32>
    %78 = math.tanh %77 : vector<1x32xf32>
    %cst_24 = arith.constant 1.000000e+00 : f32
    %79 = vector.broadcast %cst_24 : f32 to vector<1x32xf32>
    %80 = arith.subf %79, %73 : vector<1x32xf32>
    %81 = arith.mulf %80, %78 : vector<1x32xf32>
    %82 = arith.mulf %73, %60 : vector<1x32xf32>
    %83 = arith.addf %81, %82 : vector<1x32xf32>
    %c2 = arith.constant 2 : index
    %c0_25 = arith.constant 0 : index
    %84 = vector.load %arg6[%c2, %c0_25] : memref<8x32xf32, #tpu.memory_space<vmem>>, vector<1x32xf32>
    tpu.vector_store %arg6[%c2, %c0_25], %83 {strides = array<i32>} : memref<8x32xf32, #tpu.memory_space<vmem>>, vector<1x32xf32>,
    %85 = vector.extract_strided_slice %12 {offsets = [3, 0], sizes = [1, 96], strides = [1, 1]} : vector<8x96xf32> to vector<1x96xf32>
    %cst_26 = arith.constant dense<0.000000e+00> : vector<1x96xf32>
    %86 = tpu.matmul %83, %13, %cst_26 {dimension_numbers = #tpu.dot_dimension_numbers<[1], [0], [0], [1], [0, 0, 1, 1], [], []>} : vector<1x32xf32>, vector<32x96xf32>, vector<1x96xf32> -> vector<1x96xf32>
    %87 = arith.addf %86, %14 : vector<1x96xf32>
    %88 = arith.addf %85, %87 : vector<1x96xf32>
    %89 = vector.extract_strided_slice %88 {offsets = [0, 0], sizes = [1, 64], strides = [1, 1]} : vector<1x96xf32> to vector<1x64xf32>
    %90 = arith.negf %89 : vector<1x64xf32>
    %91 = math.exp %90 : vector<1x64xf32>
    %cst_27 = arith.constant 1.000000e+00 : f32
    %92 = vector.broadcast %cst_27 : f32 to vector<1x64xf32>
    %93 = arith.addf %92, %91 : vector<1x64xf32>
    %94 = arith.divf %92, %93 : vector<1x64xf32>
    %95 = vector.extract_strided_slice %94 {offsets = [0, 0], sizes = [1, 32], strides = [1, 1]} : vector<1x64xf32> to vector<1x32xf32>
    %96 = vector.extract_strided_slice %94 {offsets = [0, 32], sizes = [1, 32], strides = [1, 1]} : vector<1x64xf32> to vector<1x32xf32>
    %97 = vector.extract_strided_slice %85 {offsets = [0, 64], sizes = [1, 32], strides = [1, 1]} : vector<1x96xf32> to vector<1x32xf32>
    %98 = vector.extract_strided_slice %87 {offsets = [0, 64], sizes = [1, 32], strides = [1, 1]} : vector<1x96xf32> to vector<1x32xf32>
    %99 = arith.mulf %95, %98 : vector<1x32xf32>
    %100 = arith.addf %97, %99 : vector<1x32xf32>
    %101 = math.tanh %100 : vector<1x32xf32>
    %cst_28 = arith.constant 1.000000e+00 : f32
    %102 = vector.broadcast %cst_28 : f32 to vector<1x32xf32>
    %103 = arith.subf %102, %96 : vector<1x32xf32>
    %104 = arith.mulf %103, %101 : vector<1x32xf32>
    %105 = arith.mulf %96, %83 : vector<1x32xf32>
    %106 = arith.addf %104, %105 : vector<1x32xf32>
    %c3 = arith.constant 3 : index
    %c0_29 = arith.constant 0 : index
    %107 = vector.load %arg6[%c3, %c0_29] : memref<8x32xf32, #tpu.memory_space<vmem>>, vector<1x32xf32>
    tpu.vector_store %arg6[%c3, %c0_29], %106 {strides = array<i32>} : memref<8x32xf32, #tpu.memory_space<vmem>>, vector<1x32xf32>,
    %108 = vector.extract_strided_slice %12 {offsets = [4, 0], sizes = [1, 96], strides = [1, 1]} : vector<8x96xf32> to vector<1x96xf32>
    %cst_30 = arith.constant dense<0.000000e+00> : vector<1x96xf32>
    %109 = tpu.matmul %106, %13, %cst_30 {dimension_numbers = #tpu.dot_dimension_numbers<[1], [0], [0], [1], [0, 0, 1, 1], [], []>} : vector<1x32xf32>, vector<32x96xf32>, vector<1x96xf32> -> vector<1x96xf32>
    %110 = arith.addf %109, %14 : vector<1x96xf32>
    %111 = arith.addf %108, %110 : vector<1x96xf32>
    %112 = vector.extract_strided_slice %111 {offsets = [0, 0], sizes = [1, 64], strides = [1, 1]} : vector<1x96xf32> to vector<1x64xf32>
    %113 = arith.negf %112 : vector<1x64xf32>
    %114 = math.exp %113 : vector<1x64xf32>
    %cst_31 = arith.constant 1.000000e+00 : f32
    %115 = vector.broadcast %cst_31 : f32 to vector<1x64xf32>
    %116 = arith.addf %115, %114 : vector<1x64xf32>
    %117 = arith.divf %115, %116 : vector<1x64xf32>
    %118 = vector.extract_strided_slice %117 {offsets = [0, 0], sizes = [1, 32], strides = [1, 1]} : vector<1x64xf32> to vector<1x32xf32>
    %119 = vector.extract_strided_slice %117 {offsets = [0, 32], sizes = [1, 32], strides = [1, 1]} : vector<1x64xf32> to vector<1x32xf32>
    %120 = vector.extract_strided_slice %108 {offsets = [0, 64], sizes = [1, 32], strides = [1, 1]} : vector<1x96xf32> to vector<1x32xf32>
    %121 = vector.extract_strided_slice %110 {offsets = [0, 64], sizes = [1, 32], strides = [1, 1]} : vector<1x96xf32> to vector<1x32xf32>
    %122 = arith.mulf %118, %121 : vector<1x32xf32>
    %123 = arith.addf %120, %122 : vector<1x32xf32>
    %124 = math.tanh %123 : vector<1x32xf32>
    %cst_32 = arith.constant 1.000000e+00 : f32
    %125 = vector.broadcast %cst_32 : f32 to vector<1x32xf32>
    %126 = arith.subf %125, %119 : vector<1x32xf32>
    %127 = arith.mulf %126, %124 : vector<1x32xf32>
    %128 = arith.mulf %119, %106 : vector<1x32xf32>
    %129 = arith.addf %127, %128 : vector<1x32xf32>
    %c4 = arith.constant 4 : index
    %c0_33 = arith.constant 0 : index
    %130 = vector.load %arg6[%c4, %c0_33] : memref<8x32xf32, #tpu.memory_space<vmem>>, vector<1x32xf32>
    tpu.vector_store %arg6[%c4, %c0_33], %129 {strides = array<i32>} : memref<8x32xf32, #tpu.memory_space<vmem>>, vector<1x32xf32>,
    %131 = vector.extract_strided_slice %12 {offsets = [5, 0], sizes = [1, 96], strides = [1, 1]} : vector<8x96xf32> to vector<1x96xf32>
    %cst_34 = arith.constant dense<0.000000e+00> : vector<1x96xf32>
    %132 = tpu.matmul %129, %13, %cst_34 {dimension_numbers = #tpu.dot_dimension_numbers<[1], [0], [0], [1], [0, 0, 1, 1], [], []>} : vector<1x32xf32>, vector<32x96xf32>, vector<1x96xf32> -> vector<1x96xf32>
    %133 = arith.addf %132, %14 : vector<1x96xf32>
    %134 = arith.addf %131, %133 : vector<1x96xf32>
    %135 = vector.extract_strided_slice %134 {offsets = [0, 0], sizes = [1, 64], strides = [1, 1]} : vector<1x96xf32> to vector<1x64xf32>
    %136 = arith.negf %135 : vector<1x64xf32>
    %137 = math.exp %136 : vector<1x64xf32>
    %cst_35 = arith.constant 1.000000e+00 : f32
    %138 = vector.broadcast %cst_35 : f32 to vector<1x64xf32>
    %139 = arith.addf %138, %137 : vector<1x64xf32>
    %140 = arith.divf %138, %139 : vector<1x64xf32>
    %141 = vector.extract_strided_slice %140 {offsets = [0, 0], sizes = [1, 32], strides = [1, 1]} : vector<1x64xf32> to vector<1x32xf32>
    %142 = vector.extract_strided_slice %140 {offsets = [0, 32], sizes = [1, 32], strides = [1, 1]} : vector<1x64xf32> to vector<1x32xf32>
    %143 = vector.extract_strided_slice %131 {offsets = [0, 64], sizes = [1, 32], strides = [1, 1]} : vector<1x96xf32> to vector<1x32xf32>
    %144 = vector.extract_strided_slice %133 {offsets = [0, 64], sizes = [1, 32], strides = [1, 1]} : vector<1x96xf32> to vector<1x32xf32>
    %145 = arith.mulf %141, %144 : vector<1x32xf32>
    %146 = arith.addf %143, %145 : vector<1x32xf32>
    %147 = math.tanh %146 : vector<1x32xf32>
    %cst_36 = arith.constant 1.000000e+00 : f32
    %148 = vector.broadcast %cst_36 : f32 to vector<1x32xf32>
    %149 = arith.subf %148, %142 : vector<1x32xf32>
    %150 = arith.mulf %149, %147 : vector<1x32xf32>
    %151 = arith.mulf %142, %129 : vector<1x32xf32>
    %152 = arith.addf %150, %151 : vector<1x32xf32>
    %c5 = arith.constant 5 : index
    %c0_37 = arith.constant 0 : index
    %153 = vector.load %arg6[%c5, %c0_37] : memref<8x32xf32, #tpu.memory_space<vmem>>, vector<1x32xf32>
    tpu.vector_store %arg6[%c5, %c0_37], %152 {strides = array<i32>} : memref<8x32xf32, #tpu.memory_space<vmem>>, vector<1x32xf32>,
    %154 = vector.extract_strided_slice %12 {offsets = [6, 0], sizes = [1, 96], strides = [1, 1]} : vector<8x96xf32> to vector<1x96xf32>
    %cst_38 = arith.constant dense<0.000000e+00> : vector<1x96xf32>
    %155 = tpu.matmul %152, %13, %cst_38 {dimension_numbers = #tpu.dot_dimension_numbers<[1], [0], [0], [1], [0, 0, 1, 1], [], []>} : vector<1x32xf32>, vector<32x96xf32>, vector<1x96xf32> -> vector<1x96xf32>
    %156 = arith.addf %155, %14 : vector<1x96xf32>
    %157 = arith.addf %154, %156 : vector<1x96xf32>
    %158 = vector.extract_strided_slice %157 {offsets = [0, 0], sizes = [1, 64], strides = [1, 1]} : vector<1x96xf32> to vector<1x64xf32>
    %159 = arith.negf %158 : vector<1x64xf32>
    %160 = math.exp %159 : vector<1x64xf32>
    %cst_39 = arith.constant 1.000000e+00 : f32
    %161 = vector.broadcast %cst_39 : f32 to vector<1x64xf32>
    %162 = arith.addf %161, %160 : vector<1x64xf32>
    %163 = arith.divf %161, %162 : vector<1x64xf32>
    %164 = vector.extract_strided_slice %163 {offsets = [0, 0], sizes = [1, 32], strides = [1, 1]} : vector<1x64xf32> to vector<1x32xf32>
    %165 = vector.extract_strided_slice %163 {offsets = [0, 32], sizes = [1, 32], strides = [1, 1]} : vector<1x64xf32> to vector<1x32xf32>
    %166 = vector.extract_strided_slice %154 {offsets = [0, 64], sizes = [1, 32], strides = [1, 1]} : vector<1x96xf32> to vector<1x32xf32>
    %167 = vector.extract_strided_slice %156 {offsets = [0, 64], sizes = [1, 32], strides = [1, 1]} : vector<1x96xf32> to vector<1x32xf32>
    %168 = arith.mulf %164, %167 : vector<1x32xf32>
    %169 = arith.addf %166, %168 : vector<1x32xf32>
    %170 = math.tanh %169 : vector<1x32xf32>
    %cst_40 = arith.constant 1.000000e+00 : f32
    %171 = vector.broadcast %cst_40 : f32 to vector<1x32xf32>
    %172 = arith.subf %171, %165 : vector<1x32xf32>
    %173 = arith.mulf %172, %170 : vector<1x32xf32>
    %174 = arith.mulf %165, %152 : vector<1x32xf32>
    %175 = arith.addf %173, %174 : vector<1x32xf32>
    %c6 = arith.constant 6 : index
    %c0_41 = arith.constant 0 : index
    %176 = vector.load %arg6[%c6, %c0_41] : memref<8x32xf32, #tpu.memory_space<vmem>>, vector<1x32xf32>
    tpu.vector_store %arg6[%c6, %c0_41], %175 {strides = array<i32>} : memref<8x32xf32, #tpu.memory_space<vmem>>, vector<1x32xf32>,
    %177 = vector.extract_strided_slice %12 {offsets = [7, 0], sizes = [1, 96], strides = [1, 1]} : vector<8x96xf32> to vector<1x96xf32>
    %cst_42 = arith.constant dense<0.000000e+00> : vector<1x96xf32>
    %178 = tpu.matmul %175, %13, %cst_42 {dimension_numbers = #tpu.dot_dimension_numbers<[1], [0], [0], [1], [0, 0, 1, 1], [], []>} : vector<1x32xf32>, vector<32x96xf32>, vector<1x96xf32> -> vector<1x96xf32>
    %179 = arith.addf %178, %14 : vector<1x96xf32>
    %180 = arith.addf %177, %179 : vector<1x96xf32>
    %181 = vector.extract_strided_slice %180 {offsets = [0, 0], sizes = [1, 64], strides = [1, 1]} : vector<1x96xf32> to vector<1x64xf32>
    %182 = arith.negf %181 : vector<1x64xf32>
    %183 = math.exp %182 : vector<1x64xf32>
    %cst_43 = arith.constant 1.000000e+00 : f32
    %184 = vector.broadcast %cst_43 : f32 to vector<1x64xf32>
    %185 = arith.addf %184, %183 : vector<1x64xf32>
    %186 = arith.divf %184, %185 : vector<1x64xf32>
    %187 = vector.extract_strided_slice %186 {offsets = [0, 0], sizes = [1, 32], strides = [1, 1]} : vector<1x64xf32> to vector<1x32xf32>
    %188 = vector.extract_strided_slice %186 {offsets = [0, 32], sizes = [1, 32], strides = [1, 1]} : vector<1x64xf32> to vector<1x32xf32>
    %189 = vector.extract_strided_slice %177 {offsets = [0, 64], sizes = [1, 32], strides = [1, 1]} : vector<1x96xf32> to vector<1x32xf32>
    %190 = vector.extract_strided_slice %179 {offsets = [0, 64], sizes = [1, 32], strides = [1, 1]} : vector<1x96xf32> to vector<1x32xf32>
    %191 = arith.mulf %187, %190 : vector<1x32xf32>
    %192 = arith.addf %189, %191 : vector<1x32xf32>
    %193 = math.tanh %192 : vector<1x32xf32>
    %cst_44 = arith.constant 1.000000e+00 : f32
    %194 = vector.broadcast %cst_44 : f32 to vector<1x32xf32>
    %195 = arith.subf %194, %188 : vector<1x32xf32>
    %196 = arith.mulf %195, %193 : vector<1x32xf32>
    %197 = arith.mulf %188, %175 : vector<1x32xf32>
    %198 = arith.addf %196, %197 : vector<1x32xf32>
    %c7 = arith.constant 7 : index
    %c0_45 = arith.constant 0 : index
    %199 = vector.load %arg6[%c7, %c0_45] : memref<8x32xf32, #tpu.memory_space<vmem>>, vector<1x32xf32>
    tpu.vector_store %arg6[%c7, %c0_45], %198 {strides = array<i32>} : memref<8x32xf32, #tpu.memory_space<vmem>>, vector<1x32xf32>,
    %c0_46 = arith.constant 0 : index
    %c0_47 = arith.constant 0 : index
    %200 = vector.load %arg7[%c0_46, %c0_47] : memref<1x32xf32, #tpu.memory_space<vmem>>, vector<1x32xf32>
    tpu.vector_store %arg7[%c0_46, %c0_47], %198 {strides = array<i32>} : memref<1x32xf32, #tpu.memory_space<vmem>>, vector<1x32xf32>,
    return
  }
}

</mosaic_0001>

<bundles_post_ra>
// kernel: tpu_custom_call.1
= control target key start
LH: loop header
LB: loop body
LE: loop exit
PB: predicated region body
PF: predicated region fallthrough
CT: control target
= control target key end

     0   :  { %13 = vsyncpa [#allocation3], 0  ;;  %s1775_s0 = inlined_call_operand.vmem [shape: s32[8,1], index: 0, kind: input, shape index: {}]   ;;  %s1776_s1 = inlined_call_operand.hbm [shape: f32[32,32], index: 1, kind: input, shape index: {}]   ;;  %s1777_s2 = inlined_call_operand.hbm [shape: f32[32,96], index: 2, kind: input, shape index: {}]   ;;  %s1778_s3 = inlined_call_operand.hbm [shape: f32[32,96], index: 3, kind: input, shape index: {}]   ;;  %s1779_s4 = inlined_call_operand.vmem [shape: f32[1,96], index: 4, kind: input, shape index: {}]   ;;  %s1780_s5 = inlined_call_operand.vmem [shape: f32[1,96], index: 5, kind: input, shape index: {}]   ;;  %s1781_s6 = inlined_call_operand.hbm [shape: f32[8,32], index: 6, kind: output, shape index: {0}]   ;;  %s1782_s7 = inlined_call_operand.hbm [shape: f32[1,32], index: 7, kind: output, shape index: {1}]  }
   0x1   :  { %14 = vsyncpa [#allocation6], 0 }
   0x2   :  { %15 = vsyncpa [#allocation4], 0 }
   0x3   :  { %16 = vsyncpa [#allocation10], 0  ;;  %s1502_s24 = smov [#allocation5]   ;;  %s1503_s26 = smov [#allocation2]  }
   0x4   :  { %s36_s25 = sshll.u32 %s1502_s24, 4  ;;  %s24_s27 = sshll.u32 %s1503_s26, 4  ;;  %s37_s25 = int_to_ptr.vmem [resolvable:$true] %s36_s25  ;;  %s25_s27 = int_to_ptr.vmem [resolvable:$true] %s24_s27 }
   0x5   :  { %s1402_s28 = scalar_lea.vmem %s37_s25, 512  ;;  %p1407_p1 = scmp.lt.s32.totalorder %s37_s25, %s37_s25 }
   0x6   :  { %p1403_p0 = scmp.ne.s32.totalorder %s37_s25, %s1402_s28  ;;  %p1408_p2 = scmp.lt.s32.totalorder %s1402_s28, %s1402_s28 }
   0x8   :  { %p1409_p3 = por %p1408_p2, %p1407_p1 }
   0xa   :  { %p1410_p4 = pnand %p1409_p3, %p1403_p0 }
   0xc   :  { %1413 = shalt.err (!%p1410_p4)
}
   0xd   :  { %s1504_s29 = smov 128   ;;  %s1505_s30 = smov 8  }
   0xe   :  { %42 = dma.hbm_to_vmem [thread:$0]  %s1777_s2, 512, %s37_s25, [#allocation6], %s1504_s29, %s1504_s29, %s1505_s30  }
   0xf   :  { %s1422_s10 = scalar_lea.vmem %s25_s27, 512  ;;  %p1427_p6 = scmp.lt.s32.totalorder %s25_s27, %s25_s27 }
  0x10   :  { %p1423_p5 = scmp.ne.s32.totalorder %s25_s27, %s1422_s10  ;;  %p1428_p7 = scmp.lt.s32.totalorder %s1422_s10, %s1422_s10 }
  0x12   :  { %p1429_p8 = por %p1428_p7, %p1427_p6 }
  0x14   :  { %p1430_p9 = pnand %p1429_p8, %p1423_p5 }
  0x16   :  { %1433 = shalt.err (!%p1430_p9)
}
  0x17   :  { %30 = dma.hbm_to_vmem [thread:$0]  %s1776_s1, 512, %s25_s27, [#allocation3], %s1504_s29, %s1504_s29, %s1505_s30  }
  0x18   :  { %s1506_s13 = smov [#allocation7]  }
  0x19   :  { %s48_s14 = sshll.u32 %s1506_s13, 4  ;;  %s49_s14 = int_to_ptr.vmem [resolvable:$true] %s48_s14 }
  0x1a   :  { %s1442_s15 = scalar_lea.vmem %s49_s14, 512  ;;  %p1447_p11 = scmp.lt.s32.totalorder %s49_s14, %s49_s14 }
  0x1b   :  { %p1443_p10 = scmp.ne.s32.totalorder %s49_s14, %s1442_s15  ;;  %p1448_p12 = scmp.lt.s32.totalorder %s1442_s15, %s1442_s15 }
  0x1d   :  { %p1449_p13 = por %p1448_p12, %p1447_p11 }
  0x1f   :  { %p1450_p0 = pnand %p1449_p13, %p1443_p10 }
  0x21   :  { %1453 = shalt.err (!%p1450_p0)
}
  0x22   :  { %54 = dma.hbm_to_vmem [thread:$0]  %s1778_s3, 512, %s49_s14, [#allocation6], %s1504_s29, %s1504_s29, %s1505_s30  }
  0x23   :  { %1494 = dma.done.wait [#allocation3], 512  }
  0x24   :  { %1495 = vsyncadd [#allocation3], 4294966784 }
  0x25   :  { %1496 = dma.done.wait [#allocation6], 1024  }
  0x26   :  { %1497 = vsyncadd [#allocation6], 4294966272  ;;  %v1507_v0 = vmov 0   ;;  %v1508_v1 = vmov 0.0   ;;  %vm1509_vm0 = vmmov 0   ;;  %v68_v2 = vld [vmem:[%s1775_s0] sm:$0xff]  ;;  %v69_v10 = vlaneseq }
  0x27   :  { %1345 = vset.pattern.permute.xlu0 %v1507_v0  ;;  %1223 = vmatprep.subr.mxu0 %v1508_v1  ;;  %v80_v3 = vld [vmem:[#allocation2 + $0x18] sm:$0xff]  ;;  %v79_v4 = vld [vmem:[#allocation2 + $0x10] sm:$0xff]  ;;  %v78_v5 = vld [vmem:[#allocation2 + $0x8] sm:$0xff]  ;;  %vm81_vm1 = vcmask 261120   ;;  %s1510_s18 = smov 64   ;;  %vm347_vm3 = vcmask 253952  }
  0x28   :  { %1234 = vmatprep.subr.mxu1 %v1508_v1  ;;  %1231 = vmatprep.mubr.msk.f32.mxu0 %vm1509_vm0, %v1508_v1  ;;  %v77_v6 = vld [vmem:[#allocation2] sm:$0xff]  ;;  %v158_v7 = vld [vmem:[#allocation5 + $0x18] sm:$0xff]  ;;  %v157_v8 = vld [vmem:[#allocation5 + $0x10] sm:$0xff]  ;;  %v70_v11 = vand.u32 127, %v69_v10  ;;  %vm455_vm4 = vcmask 254977   ;;  %vm677_vm5 = vcmask 257027  }
  0x29   :  { %1242 = vmatprep.mubr.msk.f32.mxu1 %vm1509_vm0, %v1508_v1  ;;  %72 = vperm.xlu0 %1345, %v68_v2   ;;  %v156_v9 = vld [vmem:[#allocation5 + $0x8] sm:$0xff]  ;;  %v1579_v13 = vld [vmem:[#allocation7 + $0x18] sm:$0xff]  ;;  %v1583_v15 = vld [vmem:[#allocation7 + $0x10] sm:$0xff]  ;;  %vm899_vm6 = vcmask 259077   ;;  %vm566_vm7 = vcmask 256002   ;;  %vm788_vm8 = vcmask 258052  }
  0x2a   :  { %1224 = vmatpush3.msra.mxu0 %v80_v3  ;;  %1235 = vmatpush3.msra.mxu1 %v158_v7  ;;  %v1589_v16 = vld [vmem:[#allocation7 + $0x8] sm:$0xff]  ;;  %v1593_v17 = vld [vmem:[#allocation7] sm:$0xff]  ;;  %vm1010_vm9 = vcmask 260102   ;;  %s1513_s22 = smov [#allocation9]   ;;  %vm1121_vm10 = vcmask 261127  }
  0x2b   :  { %1225 = vmatprep.subr.mxu0 %v1508_v1  ;;  %1236 = vmatprep.subr.mxu1 %v1508_v1  ;;  %v155_v18 = vld [vmem:[#allocation5] sm:$0xff]  ;;  %s1140_s23 = sshll.u32 %s1513_s22, 4  ;;  %s1141_s23 = int_to_ptr.vmem [resolvable:$true] %s1140_s23 }
  0x2c   :  { %1226 = vmatpush3.msra.mxu0 %v79_v4  ;;  %1237 = vmatpush3.msra.mxu1 %v157_v8  ;;  %v1621_v21 = vld [vmem:[%s1780_s5] sm:$0x1]  ;;  %s1512_s5 = smov [#allocation8]  }
  0x2d   :  { %1227 = vmatprep.subr.mxu0 %v1508_v1  ;;  %1238 = vmatprep.subr.mxu1 %v1508_v1  ;;  %v1156_v25 = vld [vmem:[%s1779_s4] ss:$0 sm:$0xff]  ;;  %s1511_s4 = smov 96   ;;  %s1130_s21 = sshll.u32 %s1512_s5, 4  ;;  %s1131_s21 = int_to_ptr.vmem [resolvable:$true] %s1130_s21 }
  0x2e   :  { %1228 = vmatpush3.msra.mxu0 %v78_v5  ;;  %1239 = vmatpush3.msra.mxu1 %v156_v9  ;;  %s1454_s24 = scalar_lea.vmem %s1131_s21, 128  ;;  %p1459_p2 = scmp.lt.s32.totalorder %s1131_s21, %s1131_s21 }
  0x2f   :  { %1229 = vmatprep.subr.mxu0 %v1508_v1  ;;  %1240 = vmatprep.subr.mxu1 %v1508_v1  ;;  %p1455_p1 = scmp.ne.s32.totalorder %s1131_s21, %s1454_s24  ;;  %p1460_p3 = scmp.lt.s32.totalorder %s1454_s24, %s1454_s24 }
  0x30   :  { %1230 = vmatpush3.msra.mxu0 %v77_v6  ;;  %1241 = vmatpush3.msra.mxu1 %v155_v18 }
  0x31   :  { %1245 = vmatprep.subr.mxu0 %v1508_v1  ;;  %1256 = vmatprep.subr.mxu1 %v1508_v1  ;;  %p1461_p4 = por %p1460_p3, %p1459_p2 }
  0x33   :  { %p1462_p5 = pnand %p1461_p4, %p1455_p1 }
  0xa4   :  { %v73_v12 = vpop.permute.xlu0 %72 }
  0xa5   :  { %vm74_vm2 = vcmp.eq.s32.totalorder %v70_v11, %v73_v12 }
  0xa6   :  { %v1154_v14 = vsel %vm74_vm2, 1.0, %v1508_v1 }
  0xa7   :  { %1232 = vmatmul.mubr.msk.f32.vlgmr.msra.gmra.mxu0 %vm81_vm1, %v1154_v14 }
  0xa8   :  { %1246 = vmatpush3.msra.mxu0 %v1579_v13  ;;  %1253 = vmatprep.mubr.msk.f32.mxu0 %vm1509_vm0, %v1508_v1 }
  0xa9   :  { %1247 = vmatprep.subr.mxu0 %v1508_v1 }
  0xaa   :  { %1248 = vmatpush3.msra.mxu0 %v1583_v15 }
  0xab   :  { %1249 = vmatprep.subr.mxu0 %v1508_v1 }
  0xac   :  { %1250 = vmatpush3.msra.mxu0 %v1589_v16 }
  0xad   :  { %1251 = vmatprep.subr.mxu0 %v1508_v1 }
  0xae   :  { %1252 = vmatpush3.msra.mxu0 %v1593_v17 }
  0xaf   :  { %1254 = vmatmul.mubr.f32.vlgmr.msra.gmra.mxu0 %v1508_v1  ;;  %1267 = vmatprep.subr.mxu0 %v1508_v1 }
  0xb0   :  { %1268 = vmatpush3.msra.mxu0 %v1579_v13  ;;  %1275 = vmatprep.mubr.msk.f32.mxu0 %vm1509_vm0, %v1508_v1 }
  0xb1   :  { %1269 = vmatprep.subr.mxu0 %v1508_v1 }
  0xb2   :  { %1270 = vmatpush3.msra.mxu0 %v1583_v15 }
  0xb3   :  { %1271 = vmatprep.subr.mxu0 %v1508_v1 }
  0xb4   :  { %1272 = vmatpush3.msra.mxu0 %v1589_v16 }
  0xb5   :  { %1273 = vmatprep.subr.mxu0 %v1508_v1 }
  0xb6   :  { %1274 = vmatpush3.msra.mxu0 %v1593_v17 }
  0xb7   :  { %1289 = vmatprep.subr.mxu0 %v1508_v1 }
 0x167   :  { %v151_v19 = vpop.f32.mrf.mxu0 }
 0x168   :  { %1243 = vmatmul.mubr.msk.f32.vlgmr.msra.gmra.mxu1 %vm81_vm1, %v151_v19 }
 0x169   :  { %v1233_v20 = vpop.f32.mrf.mxu0  ;;  %1257 = vmatpush3.msra.mxu1 %v1579_v13  ;;  %1264 = vmatprep.mubr.msk.f32.mxu1 %vm1509_vm0, %v1508_v1 }
 0x16a   :  { %1258 = vmatprep.subr.mxu1 %v1508_v1 }
 0x16b   :  { %1259 = vmatpush3.msra.mxu1 %v1583_v15 }
 0x16c   :  { %1260 = vmatprep.subr.mxu1 %v1508_v1 }
 0x16d   :  { %1261 = vmatpush3.msra.mxu1 %v1589_v16 }
 0x16e   :  { %1262 = vmatprep.subr.mxu1 %v1508_v1 }
 0x16f   :  { %v313_v22 = vpop.f32.mrf.mxu0  ;;  %1263 = vmatpush3.msra.mxu1 %v1593_v17 }
 0x170   :  { %v314_v23 = vadd.f32 %v313_v22, %v1621_v21  ;;  %1278 = vmatprep.subr.mxu1 %v1508_v1 }
 0x171   :  { %v1255_v24 = vpop.f32.mrf.mxu0 }
 0x172   :  { %325 = vrot.lane.b32.xlu0 %v314_v23, %s1510_s18 }
 0x1e4   :  { %v326_v33 = vpop.permute.xlu0 %325 }
 0x228   :  { %v235_v26 = vpop.f32.mrf.mxu1 }
 0x229   :  { %v1632_v27 = vadd.f32 %v1156_v25, %v235_v26 }
 0x22a   :  { %v1244_v28 = vpop.f32.mrf.mxu1 }
 0x22b   :  { %v317_v29 = vadd.f32 %v314_v23, %v1632_v27 }
 0x22d   :  { %v1158_v30 = vmul.f32 -1.442695, %v317_v29 }
 0x22f   :  { %1346 = vpow2.f32 %v1158_v30 }
 0x23c   :  { %v1347_v31 = vpop.eup %1346 }
 0x23d   :  { %v321_v32 = vadd.f32 1.0, %v1347_v31 }
 0x23f   :  { %1348 = vrcp.f32 %v321_v32 }
 0x24c   :  { %v1349_v34 = vpop.eup %1348 }
 0x24d   :  { %v328_v35 = vmul.f32 %v1349_v34, %v326_v33  ;;  %v335_v39 = vsub.f32 1.0, %v1349_v34  ;;  %v341_v41 = vmul.f32 0.0, %v1349_v34 }
 0x24f   :  { %330 = vrot.lane.b32.xlu1 %v328_v35, %s1510_s18 }
 0x2c1   :  { %v331_v36 = vpop.permute.xlu1 %330 }
 0x2c2   :  { %v333_v37 = vadd.f32 %v331_v36, %v1632_v27 }
 0x2c4   :  { %1350 = vtanh.f32 %v333_v37 }
 0x2d1   :  { %v1351_v38 = vpop.eup %1350 }
 0x2d2   :  { %337 = vrot.lane.b32.xlu1 %v1351_v38, %s1511_s4 }
 0x344   :  { %v338_v40 = vpop.permute.xlu1 %337 }
 0x345   :  { %v340_v42 = vmul.f32 %v338_v40, %v335_v39 }
 0x347   :  { %v342_v43 = vadd.f32 %v341_v41, %v340_v42 }
 0x349   :  { %344 = vrot.lane.b32.xlu0 %v342_v43, %s1511_s4  ;;  %v447_v59 = vrot.slane %v342_v43, 7 }
 0x3bb   :  { %v345_v44 = vpop.permute.xlu0 %344 }
 0x3bc   :  { %348 = vst.msk [vmem:[#allocation8] sm:$0x1] %vm347_vm3, %v345_v44  ;;  %1265 = vmatmul.mubr.msk.f32.vlgmr.msra.gmra.mxu1 %vm81_vm1, %v345_v44 }
 0x3bd   :  { %1279 = vmatpush3.msra.mxu1 %v1579_v13  ;;  %1286 = vmatprep.mubr.msk.f32.mxu1 %vm1509_vm0, %v1508_v1 }
 0x3be   :  { %1280 = vmatprep.subr.mxu1 %v1508_v1 }
 0x3bf   :  { %1281 = vmatpush3.msra.mxu1 %v1583_v15 }
 0x3c0   :  { %1282 = vmatprep.subr.mxu1 %v1508_v1 }
 0x3c1   :  { %1283 = vmatpush3.msra.mxu1 %v1589_v16 }
 0x3c2   :  { %1284 = vmatprep.subr.mxu1 %v1508_v1 }
 0x3c3   :  { %1285 = vmatpush3.msra.mxu1 %v1593_v17 }
 0x3c4   :  { %1300 = vmatprep.subr.mxu1 %v1508_v1 }
 0x47c   :  { %v417_v45 = vpop.f32.mrf.mxu1 }
 0x47d   :  { %v418_v46 = vadd.f32 %v417_v45, %v1621_v21 }
 0x47e   :  { %v1266_v47 = vpop.f32.mrf.mxu1 }
 0x47f   :  { %v422_v48 = vrot.slane %v418_v46, 7 }
 0x481   :  { %431 = vrot.lane.b32.xlu1 %v422_v48, %s1510_s18  ;;  %v424_v49 = vadd.f32 %v422_v48, %v1632_v27 }
 0x483   :  { %v1160_v50 = vmul.f32 -1.442695, %v424_v49 }
 0x485   :  { %1352 = vpow2.f32 %v1160_v50 }
 0x492   :  { %v1353_v51 = vpop.eup %1352 }
 0x493   :  { %v428_v52 = vadd.f32 1.0, %v1353_v51 }
 0x495   :  { %1354 = vrcp.f32 %v428_v52 }
 0x4a2   :  { %v1355_v53 = vpop.eup %1354 }
 0x4a3   :  { %v441_v60 = vsub.f32 1.0, %v1355_v53  ;;  %v449_v63 = vmul.f32 %v1355_v53, %v447_v59 }
 0x4f3   :  { %v432_v54 = vpop.permute.xlu1 %431 }
 0x4f4   :  { %v434_v55 = vmul.f32 %v1355_v53, %v432_v54 }
 0x4f6   :  { %436 = vrot.lane.b32.xlu0 %v434_v55, %s1510_s18 }
 0x568   :  { %v437_v56 = vpop.permute.xlu0 %436 }
 0x569   :  { %v439_v57 = vadd.f32 %v437_v56, %v1632_v27 }
 0x56b   :  { %1356 = vtanh.f32 %v439_v57 }
 0x578   :  { %v1357_v58 = vpop.eup %1356 }
 0x579   :  { %443 = vrot.lane.b32.xlu1 %v1357_v58, %s1511_s4 }
 0x5eb   :  { %v444_v61 = vpop.permute.xlu1 %443 }
 0x5ec   :  { %v446_v62 = vmul.f32 %v444_v61, %v441_v60 }
 0x5ee   :  { %v1656_v0 = vadd.f32 %v449_v63, %v446_v62 }
 0x5f0   :  { %v457_v2 = vrot.slane %v1656_v0, 1  ;;  %v558_v24 = vrot.slane %v1656_v0, 7 }
 0x5f2   :  { %458 = vrot.lane.b32.xlu0 %v457_v2, %s1511_s4 }
 0x664   :  { %v459_v3 = vpop.permute.xlu0 %458 }
 0x665   :  { %1276 = vmatmul.mubr.msk.f32.vlgmr.msra.gmra.mxu0 %vm81_vm1, %v459_v3 }
 0x666   :  { %1290 = vmatpush3.msra.mxu0 %v1579_v13  ;;  %1297 = vmatprep.mubr.msk.f32.mxu0 %vm1509_vm0, %v1508_v1 }
 0x667   :  { %1291 = vmatprep.subr.mxu0 %v1508_v1 }
 0x668   :  { %1292 = vmatpush3.msra.mxu0 %v1583_v15 }
 0x669   :  { %1293 = vmatprep.subr.mxu0 %v1508_v1 }
 0x66a   :  { %1294 = vmatpush3.msra.mxu0 %v1589_v16 }
 0x66b   :  { %1295 = vmatprep.subr.mxu0 %v1508_v1 }
 0x66c   :  { %1296 = vmatpush3.msra.mxu0 %v1593_v17 }
 0x66d   :  { %1311 = vmatprep.subr.mxu0 %v1508_v1 }
 0x725   :  { %v528_v4 = vpop.f32.mrf.mxu0 }
 0x726   :  { %v529_v5 = vadd.f32 %v528_v4, %v1621_v21 }
 0x727   :  { %v1277_v6 = vpop.f32.mrf.mxu0 }
 0x728   :  { %v533_v7 = vrot.slane %v529_v5, 6 }
 0x72a   :  { %542 = vrot.lane.b32.xlu1 %v533_v7, %s1510_s18  ;;  %v535_v8 = vadd.f32 %v533_v7, %v1632_v27 }
 0x72c   :  { %v1162_v9 = vmul.f32 -1.442695, %v535_v8 }
 0x72e   :  { %1358 = vpow2.f32 %v1162_v9 }
 0x73b   :  { %v1359_v10 = vpop.eup %1358 }
 0x73c   :  { %v539_v11 = vadd.f32 1.0, %v1359_v10 }
 0x73e   :  { %1360 = vrcp.f32 %v539_v11 }
 0x74b   :  { %v1361_v12 = vpop.eup %1360 }
 0x74c   :  { %v552_v23 = vsub.f32 1.0, %v1361_v12  ;;  %v560_v26 = vmul.f32 %v1361_v12, %v558_v24 }
 0x79c   :  { %v543_v14 = vpop.permute.xlu1 %542 }
 0x79d   :  { %v545_v18 = vmul.f32 %v1361_v12, %v543_v14 }
 0x79f   :  { %547 = vrot.lane.b32.xlu0 %v545_v18, %s1510_s18 }
 0x811   :  { %v548_v19 = vpop.permute.xlu0 %547 }
 0x812   :  { %v550_v20 = vadd.f32 %v548_v19, %v1632_v27 }
 0x814   :  { %1362 = vtanh.f32 %v550_v20 }
 0x821   :  { %v1363_v22 = vpop.eup %1362 }
 0x822   :  { %554 = vrot.lane.b32.xlu1 %v1363_v22, %s1511_s4 }
 0x894   :  { %v555_v25 = vpop.permute.xlu1 %554 }
 0x895   :  { %v557_v28 = vmul.f32 %v555_v25, %v552_v23 }
 0x897   :  { %v1678_v29 = vadd.f32 %v560_v26, %v557_v28 }
 0x899   :  { %v568_v30 = vrot.slane %v1678_v29, 2  ;;  %v669_v47 = vrot.slane %v1678_v29, 7 }
 0x89b   :  { %569 = vrot.lane.b32.xlu0 %v568_v30, %s1511_s4 }
 0x90d   :  { %v570_v31 = vpop.permute.xlu0 %569 }
 0x90e   :  { %1287 = vmatmul.mubr.msk.f32.vlgmr.msra.gmra.mxu1 %vm81_vm1, %v570_v31 }
 0x90f   :  { %1301 = vmatpush3.msra.mxu1 %v1579_v13  ;;  %1308 = vmatprep.mubr.msk.f32.mxu1 %vm1509_vm0, %v1508_v1 }
 0x910   :  { %1302 = vmatprep.subr.mxu1 %v1508_v1 }
 0x911   :  { %1303 = vmatpush3.msra.mxu1 %v1583_v15 }
 0x912   :  { %1304 = vmatprep.subr.mxu1 %v1508_v1 }
 0x913   :  { %1305 = vmatpush3.msra.mxu1 %v1589_v16 }
 0x914   :  { %1306 = vmatprep.subr.mxu1 %v1508_v1 }
 0x915   :  { %1307 = vmatpush3.msra.mxu1 %v1593_v17 }
 0x916   :  { %1322 = vmatprep.subr.mxu1 %v1508_v1 }
 0x9ce   :  { %v639_v32 = vpop.f32.mrf.mxu1 }
 0x9cf   :  { %v640_v33 = vadd.f32 %v639_v32, %v1621_v21 }
 0x9d0   :  { %v1288_v34 = vpop.f32.mrf.mxu1 }
 0x9d1   :  { %v644_v35 = vrot.slane %v640_v33, 5 }
 0x9d3   :  { %653 = vrot.lane.b32.xlu1 %v644_v35, %s1510_s18  ;;  %v646_v36 = vadd.f32 %v644_v35, %v1632_v27 }
 0x9d5   :  { %v1164_v37 = vmul.f32 -1.442695, %v646_v36 }
 0x9d7   :  { %1364 = vpow2.f32 %v1164_v37 }
 0x9e4   :  { %v1365_v38 = vpop.eup %1364 }
 0x9e5   :  { %v650_v39 = vadd.f32 1.0, %v1365_v38 }
 0x9e7   :  { %1366 = vrcp.f32 %v650_v39 }
 0x9f4   :  { %v1367_v40 = vpop.eup %1366 }
 0x9f5   :  { %v663_v46 = vsub.f32 1.0, %v1367_v40  ;;  %v671_v49 = vmul.f32 %v1367_v40, %v669_v47 }
 0xa45   :  { %v654_v41 = vpop.permute.xlu1 %653 }
 0xa46   :  { %v656_v42 = vmul.f32 %v1367_v40, %v654_v41 }
 0xa48   :  { %658 = vrot.lane.b32.xlu0 %v656_v42, %s1510_s18 }
 0xaba   :  { %v659_v43 = vpop.permute.xlu0 %658 }
 0xabb   :  { %v661_v44 = vadd.f32 %v659_v43, %v1632_v27 }
 0xabd   :  { %1368 = vtanh.f32 %v661_v44 }
 0xaca   :  { %v1369_v45 = vpop.eup %1368 }
 0xacb   :  { %665 = vrot.lane.b32.xlu1 %v1369_v45, %s1511_s4 }
 0xb3d   :  { %v666_v48 = vpop.permute.xlu1 %665 }
 0xb3e   :  { %v668_v50 = vmul.f32 %v666_v48, %v663_v46 }
 0xb40   :  { %v1700_v51 = vadd.f32 %v671_v49, %v668_v50 }
 0xb42   :  { %v679_v52 = vrot.slane %v1700_v51, 3  ;;  %v780_v7 = vrot.slane %v1700_v51, 7 }
 0xb44   :  { %680 = vrot.lane.b32.xlu0 %v679_v52, %s1511_s4 }
 0xbb6   :  { %v681_v53 = vpop.permute.xlu0 %680 }
 0xbb7   :  { %1298 = vmatmul.mubr.msk.f32.vlgmr.msra.gmra.mxu0 %vm81_vm1, %v681_v53 }
 0xbb8   :  { %1312 = vmatpush3.msra.mxu0 %v1579_v13  ;;  %1319 = vmatprep.mubr.msk.f32.mxu0 %vm1509_vm0, %v1508_v1 }
 0xbb9   :  { %1313 = vmatprep.subr.mxu0 %v1508_v1 }
 0xbba   :  { %1314 = vmatpush3.msra.mxu0 %v1583_v15 }
 0xbbb   :  { %1315 = vmatprep.subr.mxu0 %v1508_v1 }
 0xbbc   :  { %1316 = vmatpush3.msra.mxu0 %v1589_v16 }
 0xbbd   :  { %1317 = vmatprep.subr.mxu0 %v1508_v1 }
 0xbbe   :  { %1318 = vmatpush3.msra.mxu0 %v1593_v17 }
 0xc77   :  { %v750_v54 = vpop.f32.mrf.mxu0 }
 0xc78   :  { %v751_v55 = vadd.f32 %v750_v54, %v1621_v21 }
 0xc79   :  { %v1299_v56 = vpop.f32.mrf.mxu0 }
 0xc7a   :  { %v755_v57 = vrot.slane %v751_v55, 4 }
 0xc7c   :  { %764 = vrot.lane.b32.xlu1 %v755_v57, %s1510_s18  ;;  %v757_v58 = vadd.f32 %v755_v57, %v1632_v27 }
 0xc7e   :  { %v1166_v59 = vmul.f32 -1.442695, %v757_v58 }
 0xc80   :  { %1370 = vpow2.f32 %v1166_v59 }
 0xc8d   :  { %v1371_v60 = vpop.eup %1370 }
 0xc8e   :  { %v761_v61 = vadd.f32 1.0, %v1371_v60 }
 0xc90   :  { %1372 = vrcp.f32 %v761_v61 }
 0xc9d   :  { %v1373_v62 = vpop.eup %1372 }
 0xc9e   :  { %v774_v6 = vsub.f32 1.0, %v1373_v62  ;;  %v782_v9 = vmul.f32 %v1373_v62, %v780_v7 }
 0xcee   :  { %v765_v63 = vpop.permute.xlu1 %764 }
 0xcef   :  { %v767_v2 = vmul.f32 %v1373_v62, %v765_v63 }
 0xcf1   :  { %769 = vrot.lane.b32.xlu0 %v767_v2, %s1510_s18 }
 0xd63   :  { %v770_v3 = vpop.permute.xlu0 %769 }
 0xd64   :  { %v772_v4 = vadd.f32 %v770_v3, %v1632_v27 }
 0xd66   :  { %1374 = vtanh.f32 %v772_v4 }
 0xd73   :  { %v1375_v5 = vpop.eup %1374 }
 0xd74   :  { %776 = vrot.lane.b32.xlu1 %v1375_v5, %s1511_s4 }
 0xde6   :  { %v777_v8 = vpop.permute.xlu1 %776 }
 0xde7   :  { %v779_v10 = vmul.f32 %v777_v8, %v774_v6 }
 0xde9   :  { %v1721_v11 = vadd.f32 %v782_v9, %v779_v10 }
 0xdeb   :  { %v790_v12 = vrot.slane %v1721_v11, 4  ;;  %v891_v31 = vrot.slane %v1721_v11, 7 }
 0xded   :  { %791 = vrot.lane.b32.xlu0 %v790_v12, %s1511_s4 }
 0xe5f   :  { %v792_v14 = vpop.permute.xlu0 %791 }
 0xe60   :  { %1309 = vmatmul.mubr.msk.f32.vlgmr.msra.gmra.mxu1 %vm81_vm1, %v792_v14 }
 0xe61   :  { %1323 = vmatpush3.msra.mxu1 %v1579_v13  ;;  %1330 = vmatprep.mubr.msk.f32.mxu1 %vm1509_vm0, %v1508_v1 }
 0xe62   :  { %1324 = vmatprep.subr.mxu1 %v1508_v1 }
 0xe63   :  { %1325 = vmatpush3.msra.mxu1 %v1583_v15 }
 0xe64   :  { %1326 = vmatprep.subr.mxu1 %v1508_v1 }
 0xe65   :  { %1327 = vmatpush3.msra.mxu1 %v1589_v16 }
 0xe66   :  { %1328 = vmatprep.subr.mxu1 %v1508_v1 }
 0xe67   :  { %1329 = vmatpush3.msra.mxu1 %v1593_v17 }
 0xf20   :  { %v861_v18 = vpop.f32.mrf.mxu1 }
 0xf21   :  { %v862_v19 = vadd.f32 %v861_v18, %v1621_v21 }
 0xf22   :  { %v1310_v20 = vpop.f32.mrf.mxu1 }
 0xf23   :  { %v866_v13 = vrot.slane %v862_v19, 3 }
 0xf25   :  { %875 = vrot.lane.b32.xlu1 %v866_v13, %s1510_s18  ;;  %v868_v22 = vadd.f32 %v866_v13, %v1632_v27 }
 0xf27   :  { %v1168_v23 = vmul.f32 -1.442695, %v868_v22 }
 0xf29   :  { %1376 = vpow2.f32 %v1168_v23 }
 0xf36   :  { %v1377_v15 = vpop.eup %1376 }
 0xf37   :  { %v872_v24 = vadd.f32 1.0, %v1377_v15 }
 0xf39   :  { %1378 = vrcp.f32 %v872_v24 }
 0xf46   :  { %v1379_v25 = vpop.eup %1378 }
 0xf47   :  { %v885_v30 = vsub.f32 1.0, %v1379_v25  ;;  %v893_v33 = vmul.f32 %v1379_v25, %v891_v31 }
 0xf97   :  { %v876_v16 = vpop.permute.xlu1 %875 }
 0xf98   :  { %v878_v26 = vmul.f32 %v1379_v25, %v876_v16 }
 0xf9a   :  { %880 = vrot.lane.b32.xlu0 %v878_v26, %s1510_s18 }
0x100c   :  { %v881_v1 = vpop.permute.xlu0 %880 }
0x100d   :  { %v883_v17 = vadd.f32 %v881_v1, %v1632_v27 }
0x100f   :  { %1380 = vtanh.f32 %v883_v17 }
0x101c   :  { %v1381_v28 = vpop.eup %1380 }
0x101d   :  { %887 = vrot.lane.b32.xlu1 %v1381_v28, %s1511_s4 }
0x108f   :  { %v888_v32 = vpop.permute.xlu1 %887 }
0x1090   :  { %v890_v34 = vmul.f32 %v888_v32, %v885_v30 }
0x1092   :  { %v894_v35 = vadd.f32 %v893_v33, %v890_v34 }
0x1094   :  { %v901_v36 = vrot.slane %v894_v35, 5  ;;  %v1002_v54 = vrot.slane %v894_v35, 7 }
0x1096   :  { %902 = vrot.lane.b32.xlu0 %v901_v36, %s1511_s4 }
0x1108   :  { %v903_v37 = vpop.permute.xlu0 %902 }
0x1109   :  { %1320 = vmatmul.mubr.msk.f32.vlgmr.msra.gmra.mxu0 %vm81_vm1, %v903_v37 }
0x11c9   :  { %v972_v38 = vpop.f32.mrf.mxu0 }
0x11ca   :  { %v973_v39 = vadd.f32 %v972_v38, %v1621_v21 }
0x11cb   :  { %v1321_v40 = vpop.f32.mrf.mxu0 }
0x11cc   :  { %v977_v41 = vrot.slane %v973_v39, 2 }
0x11ce   :  { %986 = vrot.lane.b32.xlu1 %v977_v41, %s1510_s18  ;;  %v979_v42 = vadd.f32 %v977_v41, %v1632_v27 }
0x11d0   :  { %v1170_v43 = vmul.f32 -1.442695, %v979_v42 }
0x11d2   :  { %1382 = vpow2.f32 %v1170_v43 }
0x11df   :  { %v1383_v44 = vpop.eup %1382 }
0x11e0   :  { %v983_v45 = vadd.f32 1.0, %v1383_v44 }
0x11e2   :  { %1384 = vrcp.f32 %v983_v45 }
0x11ef   :  { %v1385_v46 = vpop.eup %1384 }
0x11f0   :  { %v996_v53 = vsub.f32 1.0, %v1385_v46  ;;  %v1004_v56 = vmul.f32 %v1385_v46, %v1002_v54 }
0x1240   :  { %v987_v47 = vpop.permute.xlu1 %986 }
0x1241   :  { %v989_v48 = vmul.f32 %v1385_v46, %v987_v47 }
0x1243   :  { %991 = vrot.lane.b32.xlu0 %v989_v48, %s1510_s18 }
0x12b5   :  { %v992_v49 = vpop.permute.xlu0 %991 }
0x12b6   :  { %v994_v50 = vadd.f32 %v992_v49, %v1632_v27 }
0x12b8   :  { %1386 = vtanh.f32 %v994_v50 }
0x12c5   :  { %v1387_v52 = vpop.eup %1386 }
0x12c6   :  { %998 = vrot.lane.b32.xlu1 %v1387_v52, %s1511_s4 }
0x1338   :  { %v999_v55 = vpop.permute.xlu1 %998 }
0x1339   :  { %v1001_v57 = vmul.f32 %v999_v55, %v996_v53 }
0x133b   :  { %v1005_v58 = vadd.f32 %v1004_v56, %v1001_v57 }
0x133d   :  { %v1012_v59 = vrot.slane %v1005_v58, 6 }
0x133f   :  { %1013 = vrot.lane.b32.xlu0 %v1012_v59, %s1511_s4 }
0x13b1   :  { %v1014_v60 = vpop.permute.xlu0 %1013 }
0x13b2   :  { %1331 = vmatmul.mubr.msk.f32.vlgmr.msra.gmra.mxu1 %vm81_vm1, %v1014_v60 }
0x1472   :  { %v1083_v61 = vpop.f32.mrf.mxu1 }
0x1473   :  { %v1084_v62 = vadd.f32 %v1083_v61, %v1621_v21 }
0x1474   :  { %v1332_v63 = vpop.f32.mrf.mxu1 }
0x1475   :  { %v1088_v2 = vrot.slane %v1084_v62, 1 }
0x1477   :  { %1097 = vrot.lane.b32.xlu1 %v1088_v2, %s1510_s18  ;;  %v1090_v3 = vadd.f32 %v1088_v2, %v1632_v27 }
0x1479   :  { %v1172_v4 = vmul.f32 -1.442695, %v1090_v3 }
0x147b   :  { %1388 = vpow2.f32 %v1172_v4 }
0x1488   :  { %v1389_v5 = vpop.eup %1388 }
0x1489   :  { %v1094_v6 = vadd.f32 1.0, %v1389_v5 }
0x148b   :  { %1390 = vrcp.f32 %v1094_v6 }
0x1498   :  { %v1391_v7 = vpop.eup %1390 }
0x14e9   :  { %v1098_v8 = vpop.permute.xlu1 %1097 }
0x14ea   :  { %v1100_v9 = vmul.f32 %v1391_v7, %v1098_v8 }
0x14ec   :  { %1102 = vrot.lane.b32.xlu0 %v1100_v9, %s1510_s18 }
0x14f0   :  { %452 = vrot.lane.b32.xlu0 %v1656_v0, %s1511_s4  ;;  %v1113_v0 = vrot.slane %v1005_v58, 7 }
0x14f2   :  { %v1115_v20 = vmul.f32 %v1391_v7, %v1113_v0 }
0x14f4   :  { %674 = vrot.lane.b32.xlu0 %v1700_v51, %s1511_s4 }
0x14f8   :  { %896 = vrot.lane.b32.xlu0 %v894_v35, %s1511_s4 }
0x155e   :  { %v1103_v21 = vpop.permute.xlu0 %1102 }
0x155f   :  { %v1105_v10 = vadd.f32 %v1103_v21, %v1632_v27  ;;  %v1107_v27 = vsub.f32 1.0, %v1391_v7 }
0x1561   :  { %1392 = vtanh.f32 %v1105_v10 }
0x1562   :  { %v453_v12 = vpop.permute.xlu0 %452 }
0x1563   :  { %456 = vst.msk [vmem:[#allocation8] sm:$0x2] %vm455_vm4, %v453_v12 }
0x1566   :  { %v675_v14 = vpop.permute.xlu0 %674 }
0x1567   :  { %678 = vst.msk [vmem:[#allocation8] sm:$0x8] %vm677_vm5, %v675_v14 }
0x156a   :  { %v897_v18 = vpop.permute.xlu0 %896 }
0x156b   :  { %900 = vst.msk [vmem:[#allocation8] sm:$0x20] %vm899_vm6, %v897_v18 }
0x156e   :  { %v1393_v19 = vpop.eup %1392 }
0x156f   :  { %1109 = vrot.lane.b32.xlu1 %v1393_v19, %s1511_s4 }
0x1573   :  { %563 = vrot.lane.b32.xlu1 %v1678_v29, %s1511_s4 }
0x1577   :  { %785 = vrot.lane.b32.xlu1 %v1721_v11, %s1511_s4 }
0x157b   :  { %1007 = vrot.lane.b32.xlu1 %v1005_v58, %s1511_s4 }
0x15e1   :  { %v1110_v51 = vpop.permute.xlu1 %1109 }
0x15e2   :  { %v1112_v13 = vmul.f32 %v1110_v51, %v1107_v27 }
0x15e4   :  { %v1116_v22 = vadd.f32 %v1115_v20, %v1112_v13 }
0x15e5   :  { %v564_v23 = vpop.permute.xlu1 %563 }
0x15e6   :  { %567 = vst.msk [vmem:[#allocation8] sm:$0x4] %vm566_vm7, %v564_v23  ;;  %1118 = vrot.lane.b32.xlu0 %v1116_v22, %s1511_s4 }
0x15e9   :  { %v786_v15 = vpop.permute.xlu1 %785 }
0x15ea   :  { %789 = vst.msk [vmem:[#allocation8] sm:$0x10] %vm788_vm8, %v786_v15 }
0x15ed   :  { %v1008_v29 = vpop.permute.xlu1 %1007 }
0x15ee   :  { %1011 = vst.msk [vmem:[#allocation8] sm:$0x40] %vm1010_vm9, %v1008_v29 }
0x1658   :  { %v1119_v11 = vpop.permute.xlu0 %1118 }
0x1659   :  { %1122 = vst.msk [vmem:[#allocation8] sm:$0x80] %vm1121_vm10, %v1119_v11  ;;  %1123 = vst.msk [vmem:[#allocation9 - $0x7] sm:$0x80] %vm1121_vm10, %v1119_v11 }
0x165a   :  { %1465 = shalt.err (!%p1462_p5)
}
0x165b   :  { %1133 = dma.vmem_to_hbm [thread:$0]  %s1131_s21, 128, %s1781_s6, [#allocation4]  }
0x165c   :  { %s1474_s27 = scalar_lea.vmem %s1141_s23, 16  ;;  %s1478_s28 = scalar_lea.vmem %s1141_s23, 32 }
0x165d   :  { %p1475_p6 = scmp.ne.s32.totalorder %s1141_s23, %s1474_s27  ;;  %p1479_p7 = scmp.lt.s32.totalorder %s1141_s23, %s1141_s23 }
0x165e   :  { %p1480_p8 = scmp.lt.s32.totalorder %s1478_s28, %s1474_s27 }
0x1660   :  { %p1481_p9 = por %p1480_p8, %p1479_p7 }
0x1662   :  { %p1482_p10 = pnand %p1481_p9, %p1475_p6 }
0x1664   :  { %1485 = shalt.err (!%p1482_p10)
}
0x1665   :  { %1143 = dma.vmem_to_hbm [thread:$0]  %s1141_s23, 16, %s1782_s7, [#allocation10]  }
0x1666   :  { %1498 = dma.done.wait [#allocation4], 128  }
0x1667   :  { %1499 = vsyncadd [#allocation4], 4294967168 }
0x1668   :  { %1500 = dma.done.wait [#allocation10], 16  }
0x1669   :  { %1501 = vsyncadd [#allocation10], 4294967280 }
0x166a   :  { %1150 = vsyncpa [#allocation3], 1 }
0x166b   :  { %1151 = vsyncpa [#allocation6], 1 }
0x166c   :  { %1152 = vsyncpa [#allocation4], 1 }
0x166d   :  { %1153 = vsyncpa [#allocation10], 1 }

</bundles_post_ra>
